<compile_context>
chip_gen: v5e
topology: v5e:2x2
jax: 0.10.0
libtpu: 0.0.40
codegen_flags: <defaults>
</compile_context>

<pallas_src>
import functools

import jax
import jax.numpy as jnp
from jax.experimental import pallas as pl
from jax.experimental.pallas import tpu as pltpu


def _round_up(x, m):
    return ((x + m - 1) // m) * m


def _cum_return_kernel(x_ref, w1_ref, b1_ref, w2_ref, b2_ref, w3t_ref, o_ref, *,
                       traj_len):
    """One grid step: Q trajectories (Q*traj_len rows) -> (Q, 1) returns.

    x_ref  : (Q*T, D)  slab of timesteps (f32, cast to matmul dtype in-kernel)
    w1_ref : (D, H1)   b1_ref: (1, H1)
    w2_ref : (H1, H2)  b2_ref: (1, H2)
    w3t_ref: (1, H2)   fc2 weight transposed (no bias), f32
    o_ref  : (Q, 1)    per-trajectory cumulative return (f32)
    """
    t = traj_len
    cdt = w1_ref.dtype                 # matmul operand dtype (f32 or bf16)

    x = x_ref[...].astype(cdt)

    # fc0 + leaky_relu(0.01): MXU (M=Q*T, K=D, N=H1), f32 accumulation.
    h = jnp.dot(x, w1_ref[...], preferred_element_type=jnp.float32) + b1_ref[...]
    h = jnp.maximum(h, 0.01 * h)

    # fc1 + leaky_relu(0.01): MXU (M=Q*T, K=H1, N=H2), f32 accumulation.
    h = jnp.dot(h.astype(cdt), w2_ref[...],
                preferred_element_type=jnp.float32) + b2_ref[...]
    h = jnp.maximum(h, 0.01 * h)

    # fc2 (linear, no bias) then sum over timesteps.  Reduce over T first
    # (sublane reduce per trajectory), then a single (Q,H2) VPU multiply by
    # w3^T and a lane reduce -- no N=1 MXU pass, T-fold fewer multiplies.
    q = h.shape[0] // t
    s = jnp.sum(h.reshape(q, t, h.shape[1]), axis=1)                  # (Q, H2)
    o_ref[...] = jnp.sum(s * w3t_ref[...], axis=-1, keepdims=True)    # (Q, 1)


def cum_returns(trajs, params, *, tile_traj=32):
    """Cumulative return for each trajectory.  trajs: (N, T, D) -> (N,) f32."""
    w1, b1, w2, b2, w3t = params
    n, t, d = trajs.shape
    h1 = w1.shape[1]
    h2 = w2.shape[1]

    # Trajectories per grid step: multiple of 8 (sublane granule), targeting
    # ~512 MXU rows per step, never more than needed for small N.
    q_cap = max(8, _round_up(max(1, 512 // t), 8))
    q = min(tile_traj, q_cap, _round_up(n, 8))
    n_pad = _round_up(n, q)

    # One contiguous (N*T, D) slab; the reshape is metadata-only.  Pad only if
    # the trajectory count is not a multiple of the tile; padded trajectories
    # produce junk returns that are sliced off below.
    x = trajs.reshape(n * t, d)
    if n_pad != n:
        x = jnp.pad(x, ((0, (n_pad - n) * t), (0, 0)))

    out = pl.pallas_call(
        functools.partial(_cum_return_kernel, traj_len=t),
        out_shape=jax.ShapeDtypeStruct((n_pad, 1), jnp.float32),
        grid_spec=pltpu.PrefetchScalarGridSpec(
            num_scalar_prefetch=0,
            grid=(n_pad // q,),
            in_specs=[
                pl.BlockSpec((q * t, d), lambda i: (i, 0)),   # x tile
                pl.BlockSpec((d, h1), lambda i: (0, 0)),      # w1 (resident)
                pl.BlockSpec((1, h1), lambda i: (0, 0)),      # b1
                pl.BlockSpec((h1, h2), lambda i: (0, 0)),     # w2
                pl.BlockSpec((1, h2), lambda i: (0, 0)),      # b2
                pl.BlockSpec((1, h2), lambda i: (0, 0)),      # w3^T
            ],
            out_specs=pl.BlockSpec((q, 1), lambda i: (i, 0)),
        ),
        compiler_params=pltpu.CompilerParams(
            # Independent trajectory tiles: lets v7x's two TensorCores split
            # the grid; harmless no-op on v5e/v6e.
            dimension_semantics=("parallel",),
        ),
    )(x, w1, b1, w2, b2, w3t)

    return out[:n, 0]


def net_forward(traj_i, traj_j, params):
    """Net.forward for a single pair: returns (2,) = [cum_r_i, cum_r_j]."""
    if traj_i.shape != traj_j.shape:
        raise ValueError(f"trajectory shape mismatch: {traj_i.shape} vs {traj_j.shape}")
    trajs = jnp.stack([traj_i, traj_j], axis=0)           # (2, T, D)
    return cum_returns(trajs, params)                     # (2,)


def net_forward_batched(traj_i, traj_j, params):
    """Batched pairs: traj_i, traj_j (B, T, D) -> (B, 2) logits.

    All 2*B trajectories share one pallas_call, which is the decisive perf
    change versus one call per pair.
    """
    if traj_i.shape != traj_j.shape:
        raise ValueError(f"trajectory shape mismatch: {traj_i.shape} vs {traj_j.shape}")
    b = traj_i.shape[0]
    trajs = jnp.concatenate([traj_i, traj_j], axis=0)     # (2B, T, D)
    r = cum_returns(trajs, params)                        # (2B,)
    return jnp.stack([r[:b], r[b:]], axis=1)              # (B, 2)


def init_params(key, input_dim=25, hidden_dims=(128, 64),
                matmul_dtype=jnp.float32):
    """PyTorch nn.Linear-style init (uniform +-1/sqrt(fan_in)), kernel layout.

    w1/w2 are stored in `matmul_dtype` (bf16 recommended on v6e/v7x for the
    MXU); biases and the final fc2 weight stay f32 (epilogue runs on the VPU
    in f32).  Layout: w (in, out), b (1, out), fc2 stored transposed (1, H2).
    """
    k1, k2, k3, k4, k5 = jax.random.split(key, 5)
    h1, h2 = hidden_dims

    def unif(k, shape, fan_in):
        bound = float(fan_in) ** -0.5
        return jax.random.uniform(k, shape, jnp.float32, -bound, bound)

    w1 = unif(k1, (input_dim, h1), input_dim).astype(matmul_dtype)
    b1 = unif(k2, (1, h1), input_dim)
    w2 = unif(k3, (h1, h2), h1).astype(matmul_dtype)
    b2 = unif(k4, (1, h2), h1)
    w3t = unif(k5, (1, h2), h2)      # fc2: bias=False, stored transposed
    return (w1, b1, w2, b2, w3t)


def net_forward_ref(traj_i, traj_j, params):
    """Pure-JAX f32 reference for correctness checking (single pair)."""
    w1, b1, w2, b2, w3t = [p.astype(jnp.float32) for p in params]

    def cum_return(x):
        h = jax.nn.leaky_relu(x @ w1 + b1, negative_slope=0.01)
        h = jax.nn.leaky_relu(h @ w2 + b2, negative_slope=0.01)
        return jnp.sum(h * w3t)     # == sum(h @ w3) since fc2 is linear, no bias

    return jnp.stack([cum_return(traj_i), cum_return(traj_j)])


if __name__ == "__main__":
    key = jax.random.PRNGKey(0)
    k_params, k_i, k_j = jax.random.split(key, 3)

    INPUT_DIM = 25   # env='feeding', default flags
    T = 8            # trajectory length (seq)
    B = 2            # trajectory pairs (batched path)

    params = init_params(k_params, input_dim=INPUT_DIM, hidden_dims=(128, 64))
    traj_i = jax.random.normal(k_i, (B, T, INPUT_DIM), jnp.float32)
    traj_j = jax.random.normal(k_j, (B, T, INPUT_DIM), jnp.float32)

    # 1) Single-pair forward (exact Net.forward semantics).
    logits = jax.block_until_ready(net_forward(traj_i[0], traj_j[0], params))
    ref = net_forward_ref(traj_i[0], traj_j[0], params)
    assert logits.shape == (2,), logits.shape
    assert jnp.allclose(logits, ref, rtol=5e-4, atol=5e-4), (logits, ref)

    # 2) Batched pairs through the same kernel.
    out = jax.block_until_ready(net_forward_batched(traj_i, traj_j, params))
    ref_b = jnp.stack([net_forward_ref(traj_i[b], traj_j[b], params)
                       for b in range(B)])
    assert out.shape == (B, 2), out.shape
    assert jnp.allclose(out, ref_b, rtol=5e-4, atol=5e-4), (out, ref_b)

    # 3) bf16 MXU-operand path (v6e/v7x): f32 accumulation + f32 epilogue.
    params_bf16 = init_params(k_params, input_dim=INPUT_DIM,
                              hidden_dims=(128, 64), matmul_dtype=jnp.bfloat16)
    out_bf16 = jax.block_until_ready(
        net_forward_batched(traj_i, traj_j, params_bf16))
    ref_bf16 = jnp.stack([net_forward_ref(traj_i[b], traj_j[b], params_bf16)
                          for b in range(B)])
    assert out_bf16.shape == (B, 2), out_bf16.shape
    assert jnp.allclose(out_bf16, ref_bf16, rtol=1e-1, atol=1e-1), (out_bf16, ref_bf16)

    print("KERNEL_OK")
</pallas_src>

<mosaic_0001>
module attributes {stable_mosaic.version = 11 : i64} {
  func.func @_cum_return_kernel(%arg0: i32, %arg1: memref<64x25xf32, #tpu.memory_space<vmem>>, %arg2: memref<25x128xf32, #tpu.memory_space<vmem>>, %arg3: memref<1x128xf32, #tpu.memory_space<vmem>>, %arg4: memref<128x64xf32, #tpu.memory_space<vmem>>, %arg5: memref<1x64xf32, #tpu.memory_space<vmem>>, %arg6: memref<1x64xf32, #tpu.memory_space<vmem>>, %arg7: memref<8x1xf32, #tpu.memory_space<vmem>>) attributes {dimension_semantics = [#tpu.dimension_semantics<parallel>], iteration_bounds = array<i64: 1>, scalar_prefetch = 0 : i64, scratch_operands = 0 : i64, tpu.core_type = #tpu.core_type<tc>, window_params = [{transform_indices = @transform_0, window_bounds = array<i64: 64, 25>}, {pipeline_mode = #tpu.pipeline_mode<synchronous>, transform_indices = @transform_1, window_bounds = array<i64: 25, 128>}, {pipeline_mode = #tpu.pipeline_mode<synchronous>, transform_indices = @transform_2, window_bounds = array<i64: 1, 128>}, {pipeline_mode = #tpu.pipeline_mode<synchronous>, transform_indices = @transform_3, window_bounds = array<i64: 128, 64>}, {pipeline_mode = #tpu.pipeline_mode<synchronous>, transform_indices = @transform_4, window_bounds = array<i64: 1, 64>}, {pipeline_mode = #tpu.pipeline_mode<synchronous>, transform_indices = @transform_5, window_bounds = array<i64: 1, 64>}, {transform_indices = @transform_6, window_bounds = array<i64: 8, 1>}]} {
    %c0 = arith.constant 0 : index
    %c0_0 = arith.constant 0 : index
    %0 = vector.load %arg1[%c0, %c0_0] : memref<64x25xf32, #tpu.memory_space<vmem>>, vector<64x25xf32>
    %c0_1 = arith.constant 0 : index
    %c0_2 = arith.constant 0 : index
    %1 = vector.load %arg2[%c0_1, %c0_2] : memref<25x128xf32, #tpu.memory_space<vmem>>, vector<25x128xf32>
    %cst = arith.constant dense<0.000000e+00> : vector<64x128xf32>
    %2 = tpu.matmul %0, %1, %cst {dimension_numbers = #tpu.dot_dimension_numbers<[1], [0], [0], [1], [0, 0, 1, 1], [], []>} : vector<64x25xf32>, vector<25x128xf32>, vector<64x128xf32> -> vector<64x128xf32>
    %c0_3 = arith.constant 0 : index
    %c0_4 = arith.constant 0 : index
    %3 = vector.load %arg3[%c0_3, %c0_4] : memref<1x128xf32, #tpu.memory_space<vmem>>, vector<1x128xf32>
    %4 = vector.broadcast %3 : vector<1x128xf32> to vector<64x128xf32>
    %5 = arith.addf %2, %4 : vector<64x128xf32>
    %cst_5 = arith.constant 0.00999999977 : f32
    %6 = vector.broadcast %cst_5 : f32 to vector<64x128xf32>
    %7 = arith.mulf %6, %5 : vector<64x128xf32>
    %8 = arith.maximumf %5, %7 : vector<64x128xf32>
    %c0_6 = arith.constant 0 : index
    %c0_7 = arith.constant 0 : index
    %9 = vector.load %arg4[%c0_6, %c0_7] : memref<128x64xf32, #tpu.memory_space<vmem>>, vector<128x64xf32>
    %cst_8 = arith.constant dense<0.000000e+00> : vector<64x64xf32>
    %10 = tpu.matmul %8, %9, %cst_8 {dimension_numbers = #tpu.dot_dimension_numbers<[1], [0], [0], [1], [0, 0, 1, 1], [], []>} : vector<64x128xf32>, vector<128x64xf32>, vector<64x64xf32> -> vector<64x64xf32>
    %c0_9 = arith.constant 0 : index
    %c0_10 = arith.constant 0 : index
    %11 = vector.load %arg5[%c0_9, %c0_10] : memref<1x64xf32, #tpu.memory_space<vmem>>, vector<1x64xf32>
    %12 = vector.broadcast %11 : vector<1x64xf32> to vector<64x64xf32>
    %13 = arith.addf %10, %12 : vector<64x64xf32>
    %cst_11 = arith.constant 0.00999999977 : f32
    %14 = vector.broadcast %cst_11 : f32 to vector<64x64xf32>
    %15 = arith.mulf %14, %13 : vector<64x64xf32>
    %16 = arith.maximumf %13, %15 : vector<64x64xf32>
    %17 = vector.shape_cast %16 : vector<64x64xf32> to vector<8x8x64xf32>
    %cst_12 = arith.constant dense<0.000000e+00> : vector<8x64xf32>
    %18 = vector.multi_reduction <add>, %17, %cst_12 [1] : vector<8x8x64xf32> to vector<8x64xf32>
    %c0_13 = arith.constant 0 : index
    %c0_14 = arith.constant 0 : index
    %19 = vector.load %arg6[%c0_13, %c0_14] : memref<1x64xf32, #tpu.memory_space<vmem>>, vector<1x64xf32>
    %20 = vector.broadcast %19 : vector<1x64xf32> to vector<8x64xf32>
    %21 = arith.mulf %18, %20 : vector<8x64xf32>
    %cst_15 = arith.constant dense<0.000000e+00> : vector<8xf32>
    %22 = vector.multi_reduction <add>, %21, %cst_15 [1] : vector<8x64xf32> to vector<8xf32>
    %23 = vector.shape_cast %22 : vector<8xf32> to vector<8x1xf32>
    %c0_16 = arith.constant 0 : index
    %c0_17 = arith.constant 0 : index
    %24 = vector.load %arg7[%c0_16, %c0_17] : memref<8x1xf32, #tpu.memory_space<vmem>>, vector<8x1xf32>
    tpu.vector_store %arg7[%c0_16, %c0_17], %23 {strides = array<i32>} : memref<8x1xf32, #tpu.memory_space<vmem>>, vector<8x1xf32>,
    return
  }
  func.func @transform_0(%arg0: i32) -> (i32, i32) {
    %c0_i32 = arith.constant 0 : i32
    %c0_i32_0 = arith.constant 0 : i32
    return %arg0, %c0_i32 : i32, i32
  }
  func.func @transform_1(%arg0: i32) -> (i32, i32) {
    %c0_i32 = arith.constant 0 : i32
    %c0_i32_0 = arith.constant 0 : i32
    %c0_i32_1 = arith.constant 0 : i32
    return %c0_i32, %c0_i32_0 : i32, i32
  }
  func.func @transform_2(%arg0: i32) -> (i32, i32) {
    %c0_i32 = arith.constant 0 : i32
    %c0_i32_0 = arith.constant 0 : i32
    %c0_i32_1 = arith.constant 0 : i32
    return %c0_i32, %c0_i32_0 : i32, i32
  }
  func.func @transform_3(%arg0: i32) -> (i32, i32) {
    %c0_i32 = arith.constant 0 : i32
    %c0_i32_0 = arith.constant 0 : i32
    %c0_i32_1 = arith.constant 0 : i32
    return %c0_i32, %c0_i32_0 : i32, i32
  }
  func.func @transform_4(%arg0: i32) -> (i32, i32) {
    %c0_i32 = arith.constant 0 : i32
    %c0_i32_0 = arith.constant 0 : i32
    %c0_i32_1 = arith.constant 0 : i32
    return %c0_i32, %c0_i32_0 : i32, i32
  }
  func.func @transform_5(%arg0: i32) -> (i32, i32) {
    %c0_i32 = arith.constant 0 : i32
    %c0_i32_0 = arith.constant 0 : i32
    %c0_i32_1 = arith.constant 0 : i32
    return %c0_i32, %c0_i32_0 : i32, i32
  }
  func.func @transform_6(%arg0: i32) -> (i32, i32) {
    %c0_i32 = arith.constant 0 : i32
    %c0_i32_0 = arith.constant 0 : i32
    return %arg0, %c0_i32 : i32, i32
  }
}

</mosaic_0001>

<bundles_post_ra>
// kernel: tpu_custom_call.1
= control target key start
LH: loop header
LB: loop body
LE: loop exit
PB: predicated region body
PF: predicated region fallthrough
CT: control target
= control target key end

     0   :  { %vm64_vm0 = vcmask 1040384   ;;  %vm39_vm1 = vcmask 203776   ;;  %vm202_vm2 = vcmask 523264   ;;  %vm280_vm3 = vcmask 1041409   ;;  %s506_s1 = inlined_call_operand.vmem [shape: f32[25,128], index: 1, kind: input, shape index: {}]   ;;  %s507_s0 = inlined_call_operand.vmem [shape: f32[64,25], index: 0, kind: input, shape index: {}]   ;;  %s508_s2 = inlined_call_operand.vmem [shape: f32[1,128], index: 2, kind: input, shape index: {}]   ;;  %s509_s3 = inlined_call_operand.vmem [shape: f32[128,64], index: 3, kind: input, shape index: {}]   ;;  %s510_s4 = inlined_call_operand.vmem [shape: f32[1,64], index: 4, kind: input, shape index: {}]   ;;  %s511_s5 = inlined_call_operand.vmem [shape: f32[1,64], index: 5, kind: input, shape index: {}]   ;;  %s512_s6 = inlined_call_operand.vmem [shape: f32[8,1], index: 6, kind: output, shape index: {}]  }
   0x1   :  { %v34_v0 = vld [vmem:[%s506_s1 + $0x18] sm:$0x1]  ;;  %v33_v1 = vld [vmem:[%s506_s1 + $0x10] sm:$0xff]  ;;  %v32_v2 = vld [vmem:[%s506_s1 + $0x8] sm:$0xff]  ;;  %vm283_vm4 = vcmask 1042434   ;;  %vm286_vm5 = vcmask 1043459  }
   0x2   :  { %310 = vmatpush.msk.msra.mxu0 %vm64_vm0, %v34_v0  ;;  %319 = vmatpush.msk.msra.mxu3 %vm64_vm0, %v34_v0  ;;  %v31_v3 = vld [vmem:[%s506_s1] sm:$0xff]  ;;  %v29_v5 = vld [vmem:[%s507_s0 + $0x30] sm:$0xff]  ;;  %v24_v6 = vld [vmem:[%s507_s0 + $0x8] sm:$0xff]  ;;  %vm289_vm6 = vcmask 1044484   ;;  %vm292_vm7 = vcmask 1045509   ;;  %vm295_vm8 = vcmask 1046534  }
   0x3   :  { %v23_v4 = vld [vmem:[%s507_s0] sm:$0xff]  ;;  %v30_v7 = vld [vmem:[%s507_s0 + $0x38] sm:$0xff]  ;;  %v139_v9 = vld [vmem:[%s509_s3 + $0x70] sm:$0xff]  ;;  %vm298_vm9 = vcmask 1047559   ;;  %vm304_vm10 = vcmask 7168  }
   0x4   :  { %81 = vmatpush.msra.mxu0 %v33_v1  ;;  %320 = vmatpush.msra.mxu3 %v33_v1  ;;  %v140_v8 = vld [vmem:[%s509_s3 + $0x78] sm:$0xff]  ;;  %v138_v10 = vld [vmem:[%s509_s3 + $0x68] sm:$0xff]  ;;  %v137_v11 = vld [vmem:[%s509_s3 + $0x60] sm:$0xff] }
   0x5   :  { %145 = vmatpush.msra.mxu1 %v140_v8  ;;  %323 = vmatpush.msra.mxu2 %v140_v8  ;;  %v25_v12 = vld [vmem:[%s507_s0 + $0x10] sm:$0xff]  ;;  %v136_v13 = vld [vmem:[%s509_s3 + $0x58] sm:$0xff]  ;;  %v134_v15 = vld [vmem:[%s509_s3 + $0x48] sm:$0xff] }
   0x6   :  { %82 = vmatpush.msra.mxu0 %v32_v2  ;;  %321 = vmatpush.msra.mxu3 %v32_v2  ;;  %v135_v14 = vld [vmem:[%s509_s3 + $0x50] sm:$0xff]  ;;  %v133_v16 = vld [vmem:[%s509_s3 + $0x40] sm:$0xff]  ;;  %v26_v17 = vld [vmem:[%s507_s0 + $0x18] sm:$0xff] }
   0x7   :  { %146 = vmatpush.msra.mxu1 %v139_v9  ;;  %325 = vmatpush.msra.mxu2 %v139_v9  ;;  %v132_v18 = vld [vmem:[%s509_s3 + $0x38] sm:$0xff]  ;;  %v131_v19 = vld [vmem:[%s509_s3 + $0x30] sm:$0xff]  ;;  %v130_v20 = vld [vmem:[%s509_s3 + $0x28] sm:$0xff] }
   0x8   :  { %83 = vmatpush.msra.mxu0 %v31_v3  ;;  %322 = vmatpush.msra.mxu3 %v31_v3  ;;  %v129_v21 = vld [vmem:[%s509_s3 + $0x20] sm:$0xff]  ;;  %v28_v23 = vld [vmem:[%s507_s0 + $0x28] sm:$0xff]  ;;  %v128_v24 = vld [vmem:[%s509_s3 + $0x18] sm:$0xff] }
   0x9   :  { %311 = vmatmul.msk.f32.vlgmr.msra.gmra.mxu0 %vm39_vm1, %v23_v4  ;;  %317 = vmatmul.msk.f32.vlgmr.msra.gmra.mxu3 %vm39_vm1, %v29_v5  ;;  %v27_v22 = vld [vmem:[%s507_s0 + $0x20] sm:$0xff]  ;;  %v127_v25 = vld [vmem:[%s509_s3 + $0x10] sm:$0xff]  ;;  %v126_v26 = vld [vmem:[%s509_s3 + $0x8] sm:$0xff] }
   0xa   :  { %324 = vmatpush.msrb.mxu3 %v140_v8  ;;  %147 = vmatpush.msra.mxu1 %v138_v10  ;;  %v125_v27 = vld [vmem:[%s509_s3] sm:$0xff] }
   0xb   :  { %327 = vmatpush.msra.mxu2 %v138_v10  ;;  %v355_v28 = vld [vmem:[%s508_s2] ss:$0 sm:$0xff] }
   0xc   :  { %326 = vmatpush.msrb.mxu3 %v139_v9  ;;  %148 = vmatpush.msra.mxu1 %v137_v11  ;;  %v356_v0 = vld [vmem:[%s510_s4] ss:$0 sm:$0xff] }
   0xd   :  { %329 = vmatpush.msra.mxu2 %v137_v11 }
   0xe   :  { %328 = vmatpush.msrb.mxu3 %v138_v10  ;;  %149 = vmatpush.msra.mxu1 %v136_v13 }
   0xf   :  { %331 = vmatpush.msra.mxu2 %v136_v13 }
  0x10   :  { %330 = vmatpush.msrb.mxu3 %v137_v11  ;;  %150 = vmatpush.msra.mxu1 %v135_v14 }
  0x11   :  { %312 = vmatmul.msk.f32.gmra.mxu0 %vm39_vm1, %v24_v6  ;;  %318 = vmatmul.msk.f32.gmra.mxu3 %vm39_vm1, %v30_v7 }
  0x12   :  { %332 = vmatpush.msrb.mxu3 %v136_v13  ;;  %333 = vmatpush.msra.mxu2 %v135_v14 }
  0x13   :  { %151 = vmatpush.msra.mxu1 %v134_v15 }
  0x14   :  { %334 = vmatpush.msrb.mxu3 %v135_v14  ;;  %335 = vmatpush.msra.mxu2 %v134_v15 }
  0x15   :  { %152 = vmatpush.msra.mxu1 %v133_v16 }
  0x16   :  { %336 = vmatpush.msrb.mxu3 %v134_v15  ;;  %337 = vmatpush.msra.mxu2 %v133_v16 }
  0x17   :  { %153 = vmatpush.msra.mxu1 %v132_v18 }
  0x18   :  { %338 = vmatpush.msrb.mxu3 %v133_v16  ;;  %339 = vmatpush.msra.mxu2 %v132_v18 }
  0x19   :  { %313 = vmatmul.msk.f32.gmra.mxu0 %vm39_vm1, %v25_v12  ;;  %154 = vmatpush.msra.mxu1 %v131_v19 }
  0x1a   :  { %340 = vmatpush.msrb.mxu3 %v132_v18  ;;  %341 = vmatpush.msra.mxu2 %v131_v19 }
  0x1b   :  { %155 = vmatpush.msra.mxu1 %v130_v20 }
  0x1c   :  { %342 = vmatpush.msrb.mxu3 %v131_v19  ;;  %343 = vmatpush.msra.mxu2 %v130_v20 }
  0x1d   :  { %156 = vmatpush.msra.mxu1 %v129_v21 }
  0x1e   :  { %344 = vmatpush.msrb.mxu3 %v130_v20  ;;  %345 = vmatpush.msra.mxu2 %v129_v21 }
  0x1f   :  { %157 = vmatpush.msra.mxu1 %v128_v24 }
  0x20   :  { %346 = vmatpush.msrb.mxu3 %v129_v21  ;;  %347 = vmatpush.msra.mxu2 %v128_v24 }
  0x21   :  { %314 = vmatmul.msk.f32.gmra.mxu0 %vm39_vm1, %v26_v17  ;;  %158 = vmatpush.msra.mxu1 %v127_v25 }
  0x22   :  { %348 = vmatpush.msrb.mxu3 %v128_v24  ;;  %349 = vmatpush.msra.mxu2 %v127_v25 }
  0x23   :  { %159 = vmatpush.msra.mxu1 %v126_v26 }
  0x24   :  { %350 = vmatpush.msrb.mxu3 %v127_v25  ;;  %351 = vmatpush.msra.mxu2 %v126_v26 }
  0x25   :  { %160 = vmatpush.msra.mxu1 %v125_v27 }
  0x26   :  { %352 = vmatpush.msrb.mxu3 %v126_v26  ;;  %353 = vmatpush.msra.mxu2 %v125_v27 }
  0x28   :  { %354 = vmatpush.msrb.mxu3 %v125_v27 }
  0x29   :  { %315 = vmatmul.msk.f32.gmra.mxu0 %vm39_vm1, %v27_v22 }
  0x31   :  { %316 = vmatmul.msk.f32.gmra.mxu0 %vm39_vm1, %v28_v23 }
  0x86   :  { %v85_v29 = vpop.f32.mrf.mxu0 }
  0x87   :  { %v86_v30 = vadd.f32 %v355_v28, %v85_v29 }
  0x89   :  { %v109_v31 = vmul.f32 0.01, %v86_v30 }
  0x8b   :  { %v117_v32 = vmax.f32 %v86_v30, %v109_v31 }
  0x8c   :  { %v103_v33 = vpop.f32.mrf.mxu3 }
  0x8d   :  { %161 = vmatmul.f32.vlgmr.msra.gmra.mxu1 %v117_v32  ;;  %v104_v34 = vadd.f32 %v355_v28, %v103_v33 }
  0x8e   :  { %v88_v35 = vpop.f32.mrf.mxu0 }
  0x8f   :  { %v89_v36 = vadd.f32 %v355_v28, %v88_v35  ;;  %v115_v37 = vmul.f32 0.01, %v104_v34 }
  0x91   :  { %v110_v38 = vmul.f32 0.01, %v89_v36  ;;  %v123_v39 = vmax.f32 %v104_v34, %v115_v37 }
  0x93   :  { %v118_v40 = vmax.f32 %v89_v36, %v110_v38  ;;  %179 = vmatmul.f32.vlgmr.msrb.gmra.mxu3 %v123_v39 }
  0x94   :  { %v106_v41 = vpop.f32.mrf.mxu3 }
  0x95   :  { %164 = vmatmul.f32.gmra.mxu1 %v118_v40  ;;  %v107_v42 = vadd.f32 %v355_v28, %v106_v41 }
  0x96   :  { %v91_v43 = vpop.f32.mrf.mxu0 }
  0x97   :  { %v92_v44 = vadd.f32 %v355_v28, %v91_v43  ;;  %v116_v45 = vmul.f32 0.01, %v107_v42 }
  0x99   :  { %v111_v46 = vmul.f32 0.01, %v92_v44  ;;  %v124_v47 = vmax.f32 %v107_v42, %v116_v45 }
  0x9b   :  { %v119_v48 = vmax.f32 %v92_v44, %v111_v46  ;;  %182 = vmatmul.f32.gmra.mxu3 %v124_v47 }
  0x9d   :  { %167 = vmatmul.f32.gmra.mxu1 %v119_v48 }
  0x9e   :  { %v94_v49 = vpop.f32.mrf.mxu0 }
  0x9f   :  { %v95_v50 = vadd.f32 %v355_v28, %v94_v49 }
  0xa1   :  { %v112_v51 = vmul.f32 0.01, %v95_v50 }
  0xa3   :  { %v120_v52 = vmax.f32 %v95_v50, %v112_v51 }
  0xa5   :  { %170 = vmatmul.f32.vlgmr.msra.gmra.mxu2 %v120_v52 }
  0xa6   :  { %v97_v53 = vpop.f32.mrf.mxu0 }
  0xa7   :  { %v98_v54 = vadd.f32 %v355_v28, %v97_v53 }
  0xa9   :  { %v113_v55 = vmul.f32 0.01, %v98_v54 }
  0xab   :  { %v121_v56 = vmax.f32 %v98_v54, %v113_v55 }
  0xad   :  { %173 = vmatmul.f32.gmra.mxu2 %v121_v56 }
  0xae   :  { %v100_v57 = vpop.f32.mrf.mxu0 }
  0xaf   :  { %v101_v58 = vadd.f32 %v355_v28, %v100_v57 }
  0xb1   :  { %v114_v59 = vmul.f32 0.01, %v101_v58 }
  0xb3   :  { %v122_v60 = vmax.f32 %v101_v58, %v114_v59 }
  0xb5   :  { %176 = vmatmul.f32.gmra.mxu2 %v122_v60 }
 0x10a   :  { %v162_v61 = vpop.f32.mrf.mxu1 }
 0x10b   :  { %v163_v7 = vadd.f32 %v356_v0, %v162_v61 }
 0x10d   :  { %v186_v12 = vmul.f32 0.01, %v163_v7 }
 0x10f   :  { %v194_v19 = vmax.f32 %v163_v7, %v186_v12 }
 0x111   :  { %v203_v26 = vsel %vm202_vm2, %v194_v19, 0.0 }
 0x112   :  { %v165_v62 = vpop.f32.mrf.mxu1  ;;  %v204_v35 = vrot.slane %v203_v26, 4 }
 0x113   :  { %v166_v2 = vadd.f32 %v356_v0, %v165_v62 }
 0x114   :  { %v205_v43 = vadd.f32 %v204_v35, %v203_v26 }
 0x115   :  { %v187_v4 = vmul.f32 0.01, %v166_v2 }
 0x116   :  { %v180_v63 = vpop.f32.mrf.mxu3  ;;  %v206_v53 = vrot.slane %v205_v43, 2 }
 0x117   :  { %v181_v8 = vadd.f32 %v356_v0, %v180_v63  ;;  %v195_v9 = vmax.f32 %v166_v2, %v187_v4 }
 0x118   :  { %v207_v63 = vadd.f32 %v206_v53, %v205_v43 }
 0x119   :  { %v192_v14 = vmul.f32 0.01, %v181_v8  ;;  %v210_v15 = vsel %vm202_vm2, %v195_v9, 0.0 }
 0x11a   :  { %v168_v1 = vpop.f32.mrf.mxu1  ;;  %v211_v21 = vrot.slane %v210_v15, 4  ;;  %v208_v9 = vrot.slane %v207_v63, 1 }
 0x11b   :  { %v169_v3 = vadd.f32 %v356_v0, %v168_v1  ;;  %v200_v22 = vmax.f32 %v181_v8, %v192_v14 }
 0x11c   :  { %v212_v28 = vadd.f32 %v211_v21, %v210_v15  ;;  %v209_v19 = vadd.f32 %v208_v9, %v207_v63 }
 0x11d   :  { %v188_v5 = vmul.f32 0.01, %v169_v3  ;;  %v245_v30 = vsel %vm202_vm2, %v200_v22, 0.0 }
 0x11e   :  { %v183_v6 = vpop.f32.mrf.mxu3  ;;  %v246_v37 = vrot.slane %v245_v30, 4  ;;  %v213_v39 = vrot.slane %v212_v28, 2 }
 0x11f   :  { %v184_v10 = vadd.f32 %v356_v0, %v183_v6  ;;  %v196_v11 = vmax.f32 %v169_v3, %v188_v5 }
 0x120   :  { %v247_v45 = vadd.f32 %v246_v37, %v245_v30  ;;  %v214_v47 = vadd.f32 %v213_v39, %v212_v28 }
 0x121   :  { %v193_v17 = vmul.f32 0.01, %v184_v10  ;;  %v217_v18 = vsel %vm202_vm2, %v196_v11, 0.0 }
 0x122   :  { %v218_v23 = vrot.slane %v217_v18, 4  ;;  %v248_v56 = vrot.slane %v247_v45, 2  ;;  %v215_v58 = vrot.slane %v214_v47, 1 }
 0x123   :  { %v201_v25 = vmax.f32 %v184_v10, %v193_v17  ;;  %v357_v10 = vld [vmem:[%s511_s5] ss:$0 sm:$0xff] }
 0x124   :  { %v219_v32 = vadd.f32 %v218_v23, %v217_v18  ;;  %v249_v3 = vadd.f32 %v248_v56, %v247_v45  ;;  %v216_v5 = vadd.f32 %v215_v58, %v214_v47  ;;  %v263_v28 = vmul.f32 %v357_v10, %v209_v19 }
 0x125   :  { %v252_v34 = vsel %vm202_vm2, %v201_v25, 0.0 }
 0x126   :  { %v253_v40 = vrot.slane %v252_v34, 4  ;;  %v220_v41 = vrot.slane %v219_v32, 2  ;;  %v264_v15 = vmul.f32 %v357_v10, %v216_v5 }
 0x128   :  { %v171_v13 = vpop.f32.mrf.mxu2  ;;  %v254_v49 = vadd.f32 %v253_v40, %v252_v34  ;;  %v221_v51 = vadd.f32 %v220_v41, %v219_v32 }
 0x129   :  { %v172_v16 = vadd.f32 %v356_v0, %v171_v13  ;;  %v250_v13 = vrot.slane %v249_v3, 1 }
 0x12a   :  { %v255_v60 = vrot.slane %v254_v49, 2  ;;  %v222_v61 = vrot.slane %v221_v51, 1 }
 0x12b   :  { %v189_v20 = vmul.f32 0.01, %v172_v16  ;;  %v251_v22 = vadd.f32 %v250_v13, %v249_v3 }
 0x12c   :  { %v256_v7 = vadd.f32 %v255_v60, %v254_v49  ;;  %v223_v8 = vadd.f32 %v222_v61, %v221_v51 }
 0x12d   :  { %v197_v24 = vmax.f32 %v172_v16, %v189_v20 }
 0x12e   :  { %v257_v16 = vrot.slane %v256_v7, 1  ;;  %v265_v18 = vmul.f32 %v357_v10, %v223_v8 }
 0x12f   :  { %v224_v27 = vsel %vm202_vm2, %v197_v24, 0.0  ;;  %v279_v24 = vrot.slane %v264_v15, 7 }
 0x130   :  { %v225_v29 = vrot.slane %v224_v27, 4  ;;  %v174_v31 = vpop.f32.mrf.mxu2  ;;  %v258_v26 = vadd.f32 %v257_v16, %v256_v7 }
 0x131   :  { %v175_v33 = vadd.f32 %v356_v0, %v174_v31  ;;  %v269_v31 = vmul.f32 %v357_v10, %v251_v22  ;;  %v281_v35 = vsel %vm280_vm3, %v279_v24, %v263_v28 }
 0x132   :  { %v226_v36 = vadd.f32 %v225_v29, %v224_v27  ;;  %v282_v27 = vrot.slane %v265_v18, 6  ;;  %v270_v34 = vmul.f32 %v357_v10, %v258_v26 }
 0x133   :  { %v190_v38 = vmul.f32 0.01, %v175_v33  ;;  %v294_v40 = vrot.slane %v269_v31, 2 }
 0x134   :  { %v227_v44 = vrot.slane %v226_v36, 2 }
 0x135   :  { %v198_v42 = vmax.f32 %v175_v33, %v190_v38 }
 0x136   :  { %v228_v54 = vadd.f32 %v227_v44, %v226_v36  ;;  %v284_v36 = vsel %vm283_vm4, %v282_v27, %v281_v35 }
 0x137   :  { %v231_v46 = vsel %vm202_vm2, %v198_v42, 0.0  ;;  %v297_v42 = vrot.slane %v270_v34, 1 }
 0x138   :  { %v232_v48 = vrot.slane %v231_v46, 4  ;;  %v177_v50 = vpop.f32.mrf.mxu2  ;;  %v229_v1 = vrot.slane %v228_v54, 1 }
 0x139   :  { %v178_v52 = vadd.f32 %v356_v0, %v177_v50 }
 0x13a   :  { %v233_v55 = vadd.f32 %v232_v48, %v231_v46  ;;  %v230_v11 = vadd.f32 %v229_v1, %v228_v54 }
 0x13b   :  { %v191_v57 = vmul.f32 0.01, %v178_v52 }
 0x13c   :  { %v234_v59 = vrot.slane %v233_v55, 2  ;;  %v266_v20 = vmul.f32 %v357_v10, %v230_v11 }
 0x13d   :  { %v199_v62 = vmax.f32 %v178_v52, %v191_v57 }
 0x13e   :  { %v235_v2 = vadd.f32 %v234_v59, %v233_v55  ;;  %v285_v29 = vrot.slane %v266_v20, 5 }
 0x13f   :  { %v238_v4 = vsel %vm202_vm2, %v199_v62, 0.0 }
 0x140   :  { %v236_v6 = vrot.slane %v235_v2, 1  ;;  %v239_v0 = vrot.slane %v238_v4, 4  ;;  %v287_v37 = vsel %vm286_vm5, %v285_v29, %v284_v36 }
 0x142   :  { %v240_v12 = vadd.f32 %v239_v0, %v238_v4  ;;  %v237_v14 = vadd.f32 %v236_v6, %v235_v2 }
 0x144   :  { %v241_v17 = vrot.slane %v240_v12, 2  ;;  %v267_v23 = vmul.f32 %v357_v10, %v237_v14 }
 0x146   :  { %v242_v21 = vadd.f32 %v241_v17, %v240_v12  ;;  %v288_v32 = vrot.slane %v267_v23, 4 }
 0x148   :  { %v243_v25 = vrot.slane %v242_v21, 1  ;;  %v290_v39 = vsel %vm289_vm6, %v288_v32, %v287_v37 }
 0x14a   :  { %v244_v30 = vadd.f32 %v243_v25, %v242_v21 }
 0x14c   :  { %v268_v33 = vmul.f32 %v357_v10, %v244_v30 }
 0x14e   :  { %v291_v38 = vrot.slane %v268_v33, 3 }
 0x150   :  { %v293_v41 = vsel %vm292_vm7, %v291_v38, %v290_v39 }
 0x151   :  { %v296_v43 = vsel %vm295_vm8, %v294_v40, %v293_v41 }
 0x152   :  { %v299_v44 = vsel %vm298_vm9, %v297_v42, %v296_v43 }
 0x153   :  { %v301_v45 = vsel %vm202_vm2, %v299_v44, 0.0 }
 0x154   :  { %302 = vadd.xlane.f32.xlu0 %v301_v45 }
 0x1c7   :  { %v303_v46 = vpop.xlane.xlu0 %302 }
 0x1c8   :  { %305 = vst.msk [vmem:[%s512_s6] sm:$0xff] %vm304_vm10, %v303_v46 }

</bundles_post_ra>
